<compile_context>
chip_gen: v5e
topology: v5e:2x2
jax: 0.10.0
libtpu: 0.0.40
codegen_flags: <defaults>
</compile_context>

<pallas_src>
import functools

import jax
import jax.numpy as jnp
from jax.experimental import pallas as pl
from jax.experimental.pallas import tpu as pltpu

# Cast matmul operands to bf16 on v6e/v7x production shapes (MXU runs f32 at a
# fraction of bf16 rate).  Kept f32 here: at C=8 the kernel is store-bound, not
# MXU-bound, and f32 keeps the tight reference check meaningful.
_MATMUL_DTYPE = jnp.float32


# ----------------------------------------------------------------------------
# One-time probe of pltpu.roll's shift convention (np.roll vs rotate-left),
# so each conv tap is paired with the right weight regardless of jax/Mosaic
# version.  Runs a single tiny kernel once per process.
# ----------------------------------------------------------------------------
@functools.lru_cache(maxsize=None)
def _roll_matches_np_roll() -> bool:
    def probe(x_ref, o_ref):
        o_ref[...] = pltpu.roll(x_ref[...], shift=1, axis=1)

    x = jnp.tile(jnp.arange(128, dtype=jnp.float32)[None, :], (8, 1))
    y = pl.pallas_call(
        probe, out_shape=jax.ShapeDtypeStruct((8, 128), jnp.float32))(x)
    return bool(y[0, 0] == 127.0)        # np.roll(x, 1)[0] == x[-1] == 127


# ----------------------------------------------------------------------------
# Pallas kernel (one batch element):  o = relu( W2 @ im2col(s) + b )
#   s_ref     : (C, Lp)    zero-padded image, flattened (H+2)*(W+2) on lanes
#   w_ref     : (C, 9*C)   conv weight, tap-major ((dh*3+dw)*C + c_in)
#   b_ref     : (C, 1)     bias
#   o_ref     : (C, Lp)    conv output at padded/flat positions (the padding
#                          ring and lane tail are garbage; wrapper slices them)
#   patch_ref : (9*C, Lp)  VMEM scratch holding the 9 rolled taps (im2col)
# ----------------------------------------------------------------------------
def _conv3x3_relu_kernel(wp, np_roll, s_ref, w_ref, b_ref, o_ref, patch_ref):
    C, Lp = s_ref.shape
    s = s_ref[...].astype(patch_ref.dtype)
    # Tap (dh, dw) at flat output position p needs s[p + (dh-1)*wp + (dw-1)];
    # in this layout that is a pure lane roll.  For interior (valid) output
    # positions the circular wrap never happens (|off| <= wp+1 < row stride);
    # wrapped values only land on discarded ring/tail positions.
    for dh in range(3):
        for dw in range(3):
            t = dh * 3 + dw
            off = (dh - 1) * wp + (dw - 1)
            if off == 0:
                tap = s
            else:
                shift = ((-off) if np_roll else off) % Lp
                tap = pltpu.roll(s, shift=shift, axis=1)
            patch_ref[t * C:(t + 1) * C, :] = tap        # 8-sublane aligned
    # One fat MXU matmul: contraction K = 9*C instead of nine K=C matmuls.
    acc = jnp.dot(w_ref[...], patch_ref[...],
                  preferred_element_type=jnp.float32)    # (C, Lp) f32
    acc = acc + b_ref[...]                               # (C, 1) broadcast
    o_ref[...] = jnp.maximum(acc, 0.0).astype(o_ref.dtype)


def fused_conv3x3_relu(s, w_hwio, b):
    """relu(conv3x3(s) + b), 'SAME' padding.  s: (N, C, H, W) NCHW float32.

    C should be a multiple of 8 (test uses C=8) for aligned scratch writes.
    """
    N, C, H, W = s.shape
    hp, wp = H + 2, W + 2
    L = hp * wp
    Lp = ((L + 127) // 128) * 128                        # lane-dense last dim

    sp = jnp.pad(s, ((0, 0), (0, 0), (1, 1), (1, 1)))    # zero pad ('SAME')
    sf = jnp.pad(sp.reshape(N, C, L), ((0, 0), (0, 0), (0, Lp - L)))

    # (C_out, 9*C_in), tap-major to match the kernel's patch rows.
    w2 = jnp.transpose(w_hwio, (3, 0, 1, 2)).reshape(C, 9 * C)
    w2 = w2.astype(_MATMUL_DTYPE)
    b2 = b.reshape(C, 1).astype(jnp.float32)

    kernel = functools.partial(_conv3x3_relu_kernel, wp, _roll_matches_np_roll())

    out_flat = pl.pallas_call(
        kernel,
        out_shape=jax.ShapeDtypeStruct((N, C, Lp), s.dtype),
        grid_spec=pltpu.PrefetchScalarGridSpec(
            num_scalar_prefetch=0,
            grid=(N,),
            in_specs=[
                pl.BlockSpec((None, C, Lp), lambda n: (n, 0, 0)),
                pl.BlockSpec((C, 9 * C), lambda n: (0, 0)),
                pl.BlockSpec((C, 1), lambda n: (0, 0)),
            ],
            out_specs=pl.BlockSpec((None, C, Lp), lambda n: (n, 0, 0)),
            scratch_shapes=[pltpu.VMEM((9 * C, Lp), _MATMUL_DTYPE)],
        ),
        compiler_params=pltpu.CompilerParams(
            dimension_semantics=("parallel",),
            vmem_limit_bytes=32 * 1024 * 1024,
        ),
    )(sf, w2, b2)

    # Drop the lane tail pad and the padding ring -> (N, C, H, W).
    return out_flat[:, :, :L].reshape(N, C, hp, wp)[:, :, 1:H + 1, 1:W + 1]


# ----------------------------------------------------------------------------
# JAX glue (memory-bound, fuses in XLA): bilinear x2 upsample, align_corners=True
# ----------------------------------------------------------------------------
def upsample_bilinear_x2_align_corners(x):  # NCHW
    N, C, H, W = x.shape

    def interp_matrix(n_in, n_out):
        if n_in == 1:
            return jnp.ones((n_out, 1), jnp.float32)
        pos = jnp.arange(n_out, dtype=jnp.float32) * (n_in - 1) / (n_out - 1)
        lo = jnp.clip(jnp.floor(pos).astype(jnp.int32), 0, n_in - 2)
        frac = pos - lo.astype(jnp.float32)
        M = jnp.zeros((n_out, n_in), jnp.float32)
        M = M.at[jnp.arange(n_out), lo].set(1.0 - frac)
        M = M.at[jnp.arange(n_out), lo + 1].add(frac)
        return M

    Mh = interp_matrix(H, 2 * H).astype(x.dtype)
    Mw = interp_matrix(W, 2 * W).astype(x.dtype)
    y = jnp.einsum('ih,nchw->nciw', Mh, x)
    y = jnp.einsum('jw,nciw->ncij', Mw, y)
    return y


# ----------------------------------------------------------------------------
# BiFPN forward (matches the PyTorch module's return value P2_td).
# The bottom-up convs never influence P2_td, so they are omitted (previously
# they were ~2x dead work).
# ----------------------------------------------------------------------------
@jax.jit
def bifpn_forward(params, features_nchw):
    P2, P3, P4, P5, P6 = features_nchw
    up = upsample_bilinear_x2_align_corners
    P5_td = fused_conv3x3_relu(P5 + up(P6), *params['conv1_td'])
    P4_td = fused_conv3x3_relu(P4 + up(P5_td), *params['conv2_td'])
    P3_td = fused_conv3x3_relu(P3 + up(P4_td), *params['conv3_td'])
    P2_td = fused_conv3x3_relu(P2 + up(P3_td), *params['conv4_td'])
    return P2_td


# ----------------------------------------------------------------------------
# Pure-JAX reference (lax.conv) for correctness checking
# ----------------------------------------------------------------------------
def _conv3x3_ref(x_nchw, w_hwio, b):
    y = jax.lax.conv_general_dilated(
        x_nchw, w_hwio, window_strides=(1, 1), padding='SAME',
        dimension_numbers=('NCHW', 'HWIO', 'NCHW'),
        precision=jax.lax.Precision.HIGHEST)
    return y + b[None, :, None, None]


def bifpn_ref(params, features_nchw):
    relu = lambda z: jnp.maximum(z, 0.0)
    up = upsample_bilinear_x2_align_corners
    P2, P3, P4, P5, P6 = features_nchw
    P5_td = relu(_conv3x3_ref(P5 + up(P6), *params['conv1_td']))
    P4_td = relu(_conv3x3_ref(P4 + up(P5_td), *params['conv2_td']))
    P3_td = relu(_conv3x3_ref(P3 + up(P4_td), *params['conv3_td']))
    P2_td = relu(_conv3x3_ref(P2 + up(P3_td), *params['conv4_td']))
    return P2_td


# ----------------------------------------------------------------------------
# Deterministic parameter init (nn.Conv2d default: U(-1/sqrt(fan_in), +))
# All 8 convs are initialized for parity with the module; only *_td are used.
# ----------------------------------------------------------------------------
def init_params(channels, key):
    names = ['conv1_td', 'conv2_td', 'conv3_td', 'conv4_td',
             'conv1_bu', 'conv2_bu', 'conv3_bu', 'conv4_bu']
    params = {}
    bound = 1.0 / (channels * 9) ** 0.5
    for i, name in enumerate(names):
        kw, kb = jax.random.split(jax.random.fold_in(key, i))
        w = jax.random.uniform(kw, (3, 3, channels, channels),
                               jnp.float32, -bound, bound)   # HWIO
        b = jax.random.uniform(kb, (channels,), jnp.float32, -bound, bound)
        params[name] = (w, b)
    return params


if __name__ == "__main__":
    key = jax.random.PRNGKey(0)
    N, C = 2, 8
    sizes = [32, 16, 8, 4, 2]            # P2..P6 spatial sizes
    keys = jax.random.split(key, len(sizes) + 1)
    features = [jax.random.normal(keys[i], (N, C, s, s), jnp.float32)
                for i, s in enumerate(sizes)]          # NCHW, like PyTorch
    params = init_params(C, keys[-1])

    _roll_matches_np_roll()              # warm the convention probe once

    out = bifpn_forward(params, features)
    out = jax.block_until_ready(out)

    ref = bifpn_ref(params, features)
    assert out.shape == (N, C, sizes[0], sizes[0]), out.shape
    assert jnp.allclose(out, ref, atol=2e-3, rtol=2e-3), \
        float(jnp.max(jnp.abs(out - ref)))
    print("KERNEL_OK")
</pallas_src>

<mosaic_0001>
module attributes {stable_mosaic.version = 11 : i64} {
  func.func @probe(%arg0: memref<8x128xf32, #tpu.memory_space<vmem>>, %arg1: memref<8x128xf32, #tpu.memory_space<vmem>>) attributes {dimension_semantics = [], scalar_prefetch = 0 : i64, scratch_operands = 0 : i64, tpu.core_type = #tpu.core_type<tc>} {
    %c0 = arith.constant 0 : index
    %c0_0 = arith.constant 0 : index
    %0 = vector.load %arg0[%c0, %c0_0] : memref<8x128xf32, #tpu.memory_space<vmem>>, vector<8x128xf32>
    %c1_i32 = arith.constant 1 : i32
    %1 = tpu.dynamic_rotate %0 by %c1_i32 dim 1 : vector<8x128xf32>, i32 -> vector<8x128xf32>
    %c0_1 = arith.constant 0 : index
    %c0_2 = arith.constant 0 : index
    %2 = vector.load %arg1[%c0_1, %c0_2] : memref<8x128xf32, #tpu.memory_space<vmem>>, vector<8x128xf32>
    tpu.vector_store %arg1[%c0_1, %c0_2], %1 {strides = array<i32>} : memref<8x128xf32, #tpu.memory_space<vmem>>, vector<8x128xf32>,
    return
  }
}

</mosaic_0001>

<bundles_post_ra>
// kernel: tpu_custom_call.1
= control target key start
LH: loop header
LB: loop body
LE: loop exit
PB: predicated region body
PF: predicated region fallthrough
CT: control target
= control target key end

     0   :  { %6 = vsyncpa [#allocation3], 0  ;;  %s118_s0 = inlined_call_operand.hbm [shape: f32[8,128], index: 0, kind: input, shape index: {}]   ;;  %s119_s1 = inlined_call_operand.hbm [shape: f32[8,128], index: 1, kind: output, shape index: {}]  }
   0x1   :  { %7 = vsyncpa [#allocation4], 0  ;;  %s13_s8 = sshll.u32 %s118_s0, 4  ;;  %s99_s9 = smov [#allocation2]   ;;  %s14_s8 = int_to_ptr.hbm [resolvable:$true] %s13_s8 }
   0x2   :  { %s15_s10 = sshll.u32 %s99_s9, 4  ;;  %s16_s10 = int_to_ptr.vmem [resolvable:$true] %s15_s10 }
   0x3   :  { %18 = dma.hbm_to_vmem [thread:$0]  %s14_s8, 128, %s16_s10, [#allocation3]  }
   0x4   :  { %95 = dma.done.wait [#allocation3], 128  }
   0x5   :  { %96 = vsyncadd [#allocation3], 4294967168  ;;  %v23_v0 = vld [vmem:[#allocation2] sm:$0xff]  ;;  %s100_s11 = smov 1   ;;  %s101_s12 = smov [#allocation5]  }
   0x6   :  { %24 = vrot.lane.b32.xlu0 %v23_v0, %s100_s11  ;;  %s32_s13 = sshll.u32 %s101_s12, 4  ;;  %s34_s16 = sshll.u32 %s119_s1, 4  ;;  %s33_s13 = int_to_ptr.vmem [resolvable:$true] %s32_s13  ;;  %s35_s16 = int_to_ptr.hbm [resolvable:$true] %s34_s16 }
  0x78   :  { %v25_v1 = vpop.permute.xlu0 %24 }
  0x79   :  { %26 = vst [vmem:[#allocation5] sm:$0xff] %v25_v1 }
  0x7a   :  { %37 = dma.vmem_to_hbm [thread:$0]  %s33_s13, 128, %s35_s16, [#allocation4]  }
  0x7b   :  { %97 = dma.done.wait [#allocation4], 128  }
  0x7c   :  { %98 = vsyncadd [#allocation4], 4294967168 }
  0x7d   :  { %42 = vsyncpa [#allocation3], 1 }
  0x7e   :  { %43 = vsyncpa [#allocation4], 1 }

</bundles_post_ra>
